<compile_context>
chip_gen: v7x
topology: tpu7x:2x2x1
jax: 0.10.0
libtpu: 0.0.40
codegen_flags: <defaults>
</compile_context>

<pallas_src>
import functools

import jax
import jax.numpy as jnp
from jax import lax
from jax.experimental import pallas as pl
from jax.experimental.pallas import tpu as pltpu

NUM_CLASSES = 13
_LANE = 128
_MAX_TB = 8192                    # batch lanes per grid step (multiple of 128)
_VMEM_LIMIT = 40 * 1024 * 1024    # raise scoped VMEM (v5e default ~16 MiB);
                                  # <= physical VMEM on every generation.


def _round_up(x, m):
    return ((x + m - 1) // m) * m


def _r_norm_kernel(x_ref, tgt_ref, s_ref, c_ref, out_ref, *, r, num_classes,
                   valid_b):
    # x_ref  : (K, TB)    f32  -- input,  batch on lanes
    # tgt_ref: (1, TB)    i32  -- class indices, batch on lanes
    # s_ref  : (M, TB)    f32
    # c_ref  : (K, M, TB) f32  -- C_matrix transposed so c_ref[k] is one plane
    # out_ref: (1, TB)    f32  -- per-batch loss term (invalid lanes zeroed)
    x = x_ref[...]                                   # (K, TB)
    tgt = tgt_ref[...]                               # (1, TB)
    s = s_ref[...]                                   # (M, TB)

    # Fused single pass over C: each class plane feeds BOTH contractions, so
    # C bytes are read from VMEM exactly once.
    #   z_p: one-hot column pick via lane select (no mask multiply)
    #   z_y: mat-vec accumulate with the row-k broadcast of `input`
    c0 = c_ref[0]                                    # (M, TB)
    picked = jnp.where(tgt == 0, c0, jnp.zeros_like(c0))
    acc_y = c0 * x[0:1, :]
    for k in range(1, num_classes):                  # static unroll, K = 13
        c_k = c_ref[k]                               # (M, TB)
        picked = jnp.where(tgt == k, c_k, picked)
        acc_y = acc_y + c_k * x[k:k + 1, :]          # row-k broadcast over M
    z_p = s - picked
    z_y = s - acc_y

    # Per-lane (== per batch element) reductions over M (sublanes).
    diag = jnp.sum(z_y * z_p, axis=0, keepdims=True)             # (1, TB)

    if r == 2:
        z_p_norm = jnp.sqrt(jnp.sum(z_p * z_p, axis=0, keepdims=True))
        z_y_sq = jnp.sum(z_y * z_y, axis=0, keepdims=True)
        # diag / ||z_y|| == diag * rsqrt(sum z_y^2)  (EUP, off the VALU path)
        val = z_p_norm - diag * lax.rsqrt(z_y_sq)
    else:
        abs_p = jnp.abs(z_p)
        abs_y = jnp.abs(z_y)
        if isinstance(r, int) and r >= 1:
            # |z|^r via repeated multiplication (keeps the EUP free).
            pow_p = abs_p
            pow_y = abs_y
            for _ in range(r - 1):
                pow_p = pow_p * abs_p
                pow_y = pow_y * abs_y
        else:
            rf = jnp.float32(r)
            pow_p = abs_p ** rf
            pow_y = abs_y ** rf
        inv_r = jnp.float32(1.0 / r)
        z_p_norm = jnp.sum(pow_p, axis=0, keepdims=True) ** inv_r
        z_y_norm = jnp.sum(pow_y, axis=0, keepdims=True) ** inv_r
        val = z_p_norm - diag / z_y_norm

    # Zero padded / ragged tail lanes in-kernel so the wrapper can sum the
    # whole lane-dense output without slicing (no NaN escapes the kernel).
    tb = out_ref.shape[-1]
    lane = lax.broadcasted_iota(jnp.int32, (1, tb), 1)
    gidx = pl.program_id(0) * tb + lane
    out_ref[...] = jnp.where(gidx < valid_b, val, jnp.zeros_like(val))


@functools.partial(jax.jit, static_argnames=("r",))
def _r_norm_forward_impl(inp, target, s, c_matrix, *, r):
    inp = inp.astype(jnp.float32)
    s = s.astype(jnp.float32)
    c_matrix = c_matrix.astype(jnp.float32)
    target = target.reshape(-1).astype(jnp.int32)

    B, K = inp.shape
    M = c_matrix.shape[1]

    # Batch on the 128-wide lane axis; pad only to a lane multiple.
    b_pad = _round_up(B, _LANE)

    # Tile selection: big tiles amortize per-step pipeline overhead; for
    # small/medium batches split into (at least) two tiles so the "parallel"
    # grid axis can use both TensorCores on v7x.
    if b_pad <= 2 * _MAX_TB:
        tb = max(_LANE, _round_up(pl.cdiv(b_pad, 2), _LANE))
    else:
        tb = _MAX_TB
    num_tiles = pl.cdiv(b_pad, tb)
    pad = b_pad - B

    # Transpose to batch-last FIRST, then pad the (now minor) batch axis:
    # one fused copy per tensor instead of pad-copy + transpose-copy.
    x_t = jnp.pad(inp.T, ((0, 0), (0, pad)))                               # (K, Bp)
    tgt_t = jnp.pad(target.reshape(1, B), ((0, 0), (0, pad)))              # (1, Bp)
    s_t = jnp.pad(s.T, ((0, 0), (0, pad)))                                 # (M, Bp)
    c_t = jnp.pad(c_matrix.transpose(2, 1, 0), ((0, 0), (0, 0), (0, pad)))  # (K, M, Bp)

    kernel = functools.partial(_r_norm_kernel, r=r, num_classes=K, valid_b=B)
    out = pl.pallas_call(
        kernel,
        out_shape=jax.ShapeDtypeStruct((1, b_pad), jnp.float32),
        grid_spec=pltpu.PrefetchScalarGridSpec(
            num_scalar_prefetch=0,
            grid=(num_tiles,),
            in_specs=[
                pl.BlockSpec((K, tb), lambda i: (0, i)),
                pl.BlockSpec((1, tb), lambda i: (0, i)),
                pl.BlockSpec((M, tb), lambda i: (0, i)),
                pl.BlockSpec((K, M, tb), lambda i: (0, 0, i)),
            ],
            out_specs=pl.BlockSpec((1, tb), lambda i: (0, i)),
        ),
        compiler_params=pltpu.CompilerParams(
            dimension_semantics=("parallel",),   # independent per batch tile
            vmem_limit_bytes=_VMEM_LIMIT,
        ),
    )(x_t, tgt_t, s_t, c_t)

    # Invalid lanes were zeroed in-kernel; the tiny final reduction fuses
    # into this same jit.
    return jnp.sum(out)


def r_norm_forward(inp, target, s, c_matrix, instance_weights=None, *, r=2):
    """Pallas equivalent of R_norm(r).forward(input, target, s, C_matrix, iw)."""
    del instance_weights  # unused by the reference forward pass
    return _r_norm_forward_impl(inp, target, s, c_matrix, r=r)


def _reference_forward(inp, target, s, c_matrix, r=2):
    """Pure-JAX reference mirroring the PyTorch code."""
    p = jax.nn.one_hot(target, inp.shape[1], dtype=jnp.float32)
    z_pe = jnp.einsum("bmk,bk->bm", c_matrix, p)
    z_p = s - z_pe
    z_p_norm = jnp.sum(jnp.abs(z_p) ** r, axis=1) ** (1.0 / r)
    z_ye = jnp.einsum("bmk,bk->bm", c_matrix, inp)
    z_y = s - z_ye
    z_y_norm = jnp.sum(jnp.abs(z_y) ** r, axis=1) ** (1.0 / r)
    diag = jnp.sum(z_y * z_p, axis=1)
    return jnp.sum(z_p_norm - 1.0 / z_y_norm * diag)


if __name__ == "__main__":
    key = jax.random.PRNGKey(0)
    k1, k2, k3, k4, k5 = jax.random.split(key, 5)

    B, M, K = 8, 13, NUM_CLASSES
    x = jax.nn.softmax(jax.random.normal(k1, (B, K), dtype=jnp.float32), axis=-1)
    target = jax.random.randint(k2, (B,), 0, K, dtype=jnp.int32)
    s = jax.random.normal(k3, (B, M), dtype=jnp.float32)
    c_matrix = jax.random.uniform(k4, (B, M, K), dtype=jnp.float32) + 0.5
    instance_weights = jax.random.uniform(k5, (B,), dtype=jnp.float32)

    out = r_norm_forward(x, target, s, c_matrix, instance_weights, r=2)
    out = jax.block_until_ready(out)

    ref = _reference_forward(x, target, s, c_matrix, r=2)
    assert jnp.allclose(out, ref, rtol=1e-4, atol=1e-4), (out, ref)

    print("KERNEL_OK")
</pallas_src>

<mosaic_0001>
module attributes {stable_mosaic.version = 11 : i64} {
  func.func @_r_norm_kernel(%arg0: i32, %arg1: memref<13x128xf32, #tpu.memory_space<vmem>>, %arg2: memref<1x128xi32, #tpu.memory_space<vmem>>, %arg3: memref<13x128xf32, #tpu.memory_space<vmem>>, %arg4: memref<13x13x128xf32, #tpu.memory_space<vmem>>, %arg5: memref<1x128xf32, #tpu.memory_space<vmem>>) attributes {dimension_semantics = [#tpu.dimension_semantics<parallel>], iteration_bounds = array<i64: 1>, scalar_prefetch = 0 : i64, scratch_operands = 0 : i64, tpu.core_type = #tpu.core_type<tc>, window_params = [{transform_indices = @transform_0, window_bounds = array<i64: 13, 128>}, {transform_indices = @transform_1, window_bounds = array<i64: 1, 128>}, {transform_indices = @transform_2, window_bounds = array<i64: 13, 128>}, {transform_indices = @transform_3, window_bounds = array<i64: 13, 13, 128>}, {transform_indices = @transform_4, window_bounds = array<i64: 1, 128>}]} {
    %c0 = arith.constant 0 : index
    %c0_0 = arith.constant 0 : index
    %0 = vector.load %arg1[%c0, %c0_0] : memref<13x128xf32, #tpu.memory_space<vmem>>, vector<13x128xf32>
    %c0_1 = arith.constant 0 : index
    %c0_2 = arith.constant 0 : index
    %1 = vector.load %arg2[%c0_1, %c0_2] : memref<1x128xi32, #tpu.memory_space<vmem>>, vector<1x128xi32>
    %c0_3 = arith.constant 0 : index
    %c0_4 = arith.constant 0 : index
    %2 = vector.load %arg3[%c0_3, %c0_4] : memref<13x128xf32, #tpu.memory_space<vmem>>, vector<13x128xf32>
    %c0_5 = arith.constant 0 : index
    %c0_6 = arith.constant 0 : index
    %c0_7 = arith.constant 0 : index
    %3 = vector.load %arg4[%c0_5, %c0_6, %c0_7] : memref<13x13x128xf32, #tpu.memory_space<vmem>>, vector<1x13x128xf32>
    %4 = vector.shape_cast %3 : vector<1x13x128xf32> to vector<13x128xf32>
    %c0_i32 = arith.constant 0 : i32
    %5 = vector.broadcast %c0_i32 : i32 to vector<1x128xi32>
    %6 = arith.cmpi eq, %1, %5 : vector<1x128xi32>
    %cst = arith.constant 0.000000e+00 : f32
    %7 = vector.broadcast %cst : f32 to vector<13x128xf32>
    %8 = vector.shape_cast %6 : vector<1x128xi1> to vector<1x128xi1>
    %9 = vector.broadcast %8 : vector<1x128xi1> to vector<13x128xi1>
    %10 = arith.select %9, %4, %7 : vector<13x128xi1>, vector<13x128xf32>
    %11 = vector.extract_strided_slice %0 {offsets = [0, 0], sizes = [1, 128], strides = [1, 1]} : vector<13x128xf32> to vector<1x128xf32>
    %12 = vector.broadcast %11 : vector<1x128xf32> to vector<13x128xf32>
    %13 = arith.mulf %4, %12 : vector<13x128xf32>
    %c1 = arith.constant 1 : index
    %c0_8 = arith.constant 0 : index
    %c0_9 = arith.constant 0 : index
    %14 = vector.load %arg4[%c1, %c0_8, %c0_9] : memref<13x13x128xf32, #tpu.memory_space<vmem>>, vector<1x13x128xf32>
    %15 = vector.shape_cast %14 : vector<1x13x128xf32> to vector<13x128xf32>
    %c1_i32 = arith.constant 1 : i32
    %16 = vector.broadcast %c1_i32 : i32 to vector<1x128xi32>
    %17 = arith.cmpi eq, %1, %16 : vector<1x128xi32>
    %18 = vector.shape_cast %17 : vector<1x128xi1> to vector<1x128xi1>
    %19 = vector.broadcast %18 : vector<1x128xi1> to vector<13x128xi1>
    %20 = arith.select %19, %15, %10 : vector<13x128xi1>, vector<13x128xf32>
    %21 = vector.extract_strided_slice %0 {offsets = [1, 0], sizes = [1, 128], strides = [1, 1]} : vector<13x128xf32> to vector<1x128xf32>
    %22 = vector.broadcast %21 : vector<1x128xf32> to vector<13x128xf32>
    %23 = arith.mulf %15, %22 : vector<13x128xf32>
    %24 = arith.addf %13, %23 : vector<13x128xf32>
    %c2 = arith.constant 2 : index
    %c0_10 = arith.constant 0 : index
    %c0_11 = arith.constant 0 : index
    %25 = vector.load %arg4[%c2, %c0_10, %c0_11] : memref<13x13x128xf32, #tpu.memory_space<vmem>>, vector<1x13x128xf32>
    %26 = vector.shape_cast %25 : vector<1x13x128xf32> to vector<13x128xf32>
    %c2_i32 = arith.constant 2 : i32
    %27 = vector.broadcast %c2_i32 : i32 to vector<1x128xi32>
    %28 = arith.cmpi eq, %1, %27 : vector<1x128xi32>
    %29 = vector.shape_cast %28 : vector<1x128xi1> to vector<1x128xi1>
    %30 = vector.broadcast %29 : vector<1x128xi1> to vector<13x128xi1>
    %31 = arith.select %30, %26, %20 : vector<13x128xi1>, vector<13x128xf32>
    %32 = vector.extract_strided_slice %0 {offsets = [2, 0], sizes = [1, 128], strides = [1, 1]} : vector<13x128xf32> to vector<1x128xf32>
    %33 = vector.broadcast %32 : vector<1x128xf32> to vector<13x128xf32>
    %34 = arith.mulf %26, %33 : vector<13x128xf32>
    %35 = arith.addf %24, %34 : vector<13x128xf32>
    %c3 = arith.constant 3 : index
    %c0_12 = arith.constant 0 : index
    %c0_13 = arith.constant 0 : index
    %36 = vector.load %arg4[%c3, %c0_12, %c0_13] : memref<13x13x128xf32, #tpu.memory_space<vmem>>, vector<1x13x128xf32>
    %37 = vector.shape_cast %36 : vector<1x13x128xf32> to vector<13x128xf32>
    %c3_i32 = arith.constant 3 : i32
    %38 = vector.broadcast %c3_i32 : i32 to vector<1x128xi32>
    %39 = arith.cmpi eq, %1, %38 : vector<1x128xi32>
    %40 = vector.shape_cast %39 : vector<1x128xi1> to vector<1x128xi1>
    %41 = vector.broadcast %40 : vector<1x128xi1> to vector<13x128xi1>
    %42 = arith.select %41, %37, %31 : vector<13x128xi1>, vector<13x128xf32>
    %43 = vector.extract_strided_slice %0 {offsets = [3, 0], sizes = [1, 128], strides = [1, 1]} : vector<13x128xf32> to vector<1x128xf32>
    %44 = vector.broadcast %43 : vector<1x128xf32> to vector<13x128xf32>
    %45 = arith.mulf %37, %44 : vector<13x128xf32>
    %46 = arith.addf %35, %45 : vector<13x128xf32>
    %c4 = arith.constant 4 : index
    %c0_14 = arith.constant 0 : index
    %c0_15 = arith.constant 0 : index
    %47 = vector.load %arg4[%c4, %c0_14, %c0_15] : memref<13x13x128xf32, #tpu.memory_space<vmem>>, vector<1x13x128xf32>
    %48 = vector.shape_cast %47 : vector<1x13x128xf32> to vector<13x128xf32>
    %c4_i32 = arith.constant 4 : i32
    %49 = vector.broadcast %c4_i32 : i32 to vector<1x128xi32>
    %50 = arith.cmpi eq, %1, %49 : vector<1x128xi32>
    %51 = vector.shape_cast %50 : vector<1x128xi1> to vector<1x128xi1>
    %52 = vector.broadcast %51 : vector<1x128xi1> to vector<13x128xi1>
    %53 = arith.select %52, %48, %42 : vector<13x128xi1>, vector<13x128xf32>
    %54 = vector.extract_strided_slice %0 {offsets = [4, 0], sizes = [1, 128], strides = [1, 1]} : vector<13x128xf32> to vector<1x128xf32>
    %55 = vector.broadcast %54 : vector<1x128xf32> to vector<13x128xf32>
    %56 = arith.mulf %48, %55 : vector<13x128xf32>
    %57 = arith.addf %46, %56 : vector<13x128xf32>
    %c5 = arith.constant 5 : index
    %c0_16 = arith.constant 0 : index
    %c0_17 = arith.constant 0 : index
    %58 = vector.load %arg4[%c5, %c0_16, %c0_17] : memref<13x13x128xf32, #tpu.memory_space<vmem>>, vector<1x13x128xf32>
    %59 = vector.shape_cast %58 : vector<1x13x128xf32> to vector<13x128xf32>
    %c5_i32 = arith.constant 5 : i32
    %60 = vector.broadcast %c5_i32 : i32 to vector<1x128xi32>
    %61 = arith.cmpi eq, %1, %60 : vector<1x128xi32>
    %62 = vector.shape_cast %61 : vector<1x128xi1> to vector<1x128xi1>
    %63 = vector.broadcast %62 : vector<1x128xi1> to vector<13x128xi1>
    %64 = arith.select %63, %59, %53 : vector<13x128xi1>, vector<13x128xf32>
    %65 = vector.extract_strided_slice %0 {offsets = [5, 0], sizes = [1, 128], strides = [1, 1]} : vector<13x128xf32> to vector<1x128xf32>
    %66 = vector.broadcast %65 : vector<1x128xf32> to vector<13x128xf32>
    %67 = arith.mulf %59, %66 : vector<13x128xf32>
    %68 = arith.addf %57, %67 : vector<13x128xf32>
    %c6 = arith.constant 6 : index
    %c0_18 = arith.constant 0 : index
    %c0_19 = arith.constant 0 : index
    %69 = vector.load %arg4[%c6, %c0_18, %c0_19] : memref<13x13x128xf32, #tpu.memory_space<vmem>>, vector<1x13x128xf32>
    %70 = vector.shape_cast %69 : vector<1x13x128xf32> to vector<13x128xf32>
    %c6_i32 = arith.constant 6 : i32
    %71 = vector.broadcast %c6_i32 : i32 to vector<1x128xi32>
    %72 = arith.cmpi eq, %1, %71 : vector<1x128xi32>
    %73 = vector.shape_cast %72 : vector<1x128xi1> to vector<1x128xi1>
    %74 = vector.broadcast %73 : vector<1x128xi1> to vector<13x128xi1>
    %75 = arith.select %74, %70, %64 : vector<13x128xi1>, vector<13x128xf32>
    %76 = vector.extract_strided_slice %0 {offsets = [6, 0], sizes = [1, 128], strides = [1, 1]} : vector<13x128xf32> to vector<1x128xf32>
    %77 = vector.broadcast %76 : vector<1x128xf32> to vector<13x128xf32>
    %78 = arith.mulf %70, %77 : vector<13x128xf32>
    %79 = arith.addf %68, %78 : vector<13x128xf32>
    %c7 = arith.constant 7 : index
    %c0_20 = arith.constant 0 : index
    %c0_21 = arith.constant 0 : index
    %80 = vector.load %arg4[%c7, %c0_20, %c0_21] : memref<13x13x128xf32, #tpu.memory_space<vmem>>, vector<1x13x128xf32>
    %81 = vector.shape_cast %80 : vector<1x13x128xf32> to vector<13x128xf32>
    %c7_i32 = arith.constant 7 : i32
    %82 = vector.broadcast %c7_i32 : i32 to vector<1x128xi32>
    %83 = arith.cmpi eq, %1, %82 : vector<1x128xi32>
    %84 = vector.shape_cast %83 : vector<1x128xi1> to vector<1x128xi1>
    %85 = vector.broadcast %84 : vector<1x128xi1> to vector<13x128xi1>
    %86 = arith.select %85, %81, %75 : vector<13x128xi1>, vector<13x128xf32>
    %87 = vector.extract_strided_slice %0 {offsets = [7, 0], sizes = [1, 128], strides = [1, 1]} : vector<13x128xf32> to vector<1x128xf32>
    %88 = vector.broadcast %87 : vector<1x128xf32> to vector<13x128xf32>
    %89 = arith.mulf %81, %88 : vector<13x128xf32>
    %90 = arith.addf %79, %89 : vector<13x128xf32>
    %c8 = arith.constant 8 : index
    %c0_22 = arith.constant 0 : index
    %c0_23 = arith.constant 0 : index
    %91 = vector.load %arg4[%c8, %c0_22, %c0_23] : memref<13x13x128xf32, #tpu.memory_space<vmem>>, vector<1x13x128xf32>
    %92 = vector.shape_cast %91 : vector<1x13x128xf32> to vector<13x128xf32>
    %c8_i32 = arith.constant 8 : i32
    %93 = vector.broadcast %c8_i32 : i32 to vector<1x128xi32>
    %94 = arith.cmpi eq, %1, %93 : vector<1x128xi32>
    %95 = vector.shape_cast %94 : vector<1x128xi1> to vector<1x128xi1>
    %96 = vector.broadcast %95 : vector<1x128xi1> to vector<13x128xi1>
    %97 = arith.select %96, %92, %86 : vector<13x128xi1>, vector<13x128xf32>
    %98 = vector.extract_strided_slice %0 {offsets = [8, 0], sizes = [1, 128], strides = [1, 1]} : vector<13x128xf32> to vector<1x128xf32>
    %99 = vector.broadcast %98 : vector<1x128xf32> to vector<13x128xf32>
    %100 = arith.mulf %92, %99 : vector<13x128xf32>
    %101 = arith.addf %90, %100 : vector<13x128xf32>
    %c9 = arith.constant 9 : index
    %c0_24 = arith.constant 0 : index
    %c0_25 = arith.constant 0 : index
    %102 = vector.load %arg4[%c9, %c0_24, %c0_25] : memref<13x13x128xf32, #tpu.memory_space<vmem>>, vector<1x13x128xf32>
    %103 = vector.shape_cast %102 : vector<1x13x128xf32> to vector<13x128xf32>
    %c9_i32 = arith.constant 9 : i32
    %104 = vector.broadcast %c9_i32 : i32 to vector<1x128xi32>
    %105 = arith.cmpi eq, %1, %104 : vector<1x128xi32>
    %106 = vector.shape_cast %105 : vector<1x128xi1> to vector<1x128xi1>
    %107 = vector.broadcast %106 : vector<1x128xi1> to vector<13x128xi1>
    %108 = arith.select %107, %103, %97 : vector<13x128xi1>, vector<13x128xf32>
    %109 = vector.extract_strided_slice %0 {offsets = [9, 0], sizes = [1, 128], strides = [1, 1]} : vector<13x128xf32> to vector<1x128xf32>
    %110 = vector.broadcast %109 : vector<1x128xf32> to vector<13x128xf32>
    %111 = arith.mulf %103, %110 : vector<13x128xf32>
    %112 = arith.addf %101, %111 : vector<13x128xf32>
    %c10 = arith.constant 10 : index
    %c0_26 = arith.constant 0 : index
    %c0_27 = arith.constant 0 : index
    %113 = vector.load %arg4[%c10, %c0_26, %c0_27] : memref<13x13x128xf32, #tpu.memory_space<vmem>>, vector<1x13x128xf32>
    %114 = vector.shape_cast %113 : vector<1x13x128xf32> to vector<13x128xf32>
    %c10_i32 = arith.constant 10 : i32
    %115 = vector.broadcast %c10_i32 : i32 to vector<1x128xi32>
    %116 = arith.cmpi eq, %1, %115 : vector<1x128xi32>
    %117 = vector.shape_cast %116 : vector<1x128xi1> to vector<1x128xi1>
    %118 = vector.broadcast %117 : vector<1x128xi1> to vector<13x128xi1>
    %119 = arith.select %118, %114, %108 : vector<13x128xi1>, vector<13x128xf32>
    %120 = vector.extract_strided_slice %0 {offsets = [10, 0], sizes = [1, 128], strides = [1, 1]} : vector<13x128xf32> to vector<1x128xf32>
    %121 = vector.broadcast %120 : vector<1x128xf32> to vector<13x128xf32>
    %122 = arith.mulf %114, %121 : vector<13x128xf32>
    %123 = arith.addf %112, %122 : vector<13x128xf32>
    %c11 = arith.constant 11 : index
    %c0_28 = arith.constant 0 : index
    %c0_29 = arith.constant 0 : index
    %124 = vector.load %arg4[%c11, %c0_28, %c0_29] : memref<13x13x128xf32, #tpu.memory_space<vmem>>, vector<1x13x128xf32>
    %125 = vector.shape_cast %124 : vector<1x13x128xf32> to vector<13x128xf32>
    %c11_i32 = arith.constant 11 : i32
    %126 = vector.broadcast %c11_i32 : i32 to vector<1x128xi32>
    %127 = arith.cmpi eq, %1, %126 : vector<1x128xi32>
    %128 = vector.shape_cast %127 : vector<1x128xi1> to vector<1x128xi1>
    %129 = vector.broadcast %128 : vector<1x128xi1> to vector<13x128xi1>
    %130 = arith.select %129, %125, %119 : vector<13x128xi1>, vector<13x128xf32>
    %131 = vector.extract_strided_slice %0 {offsets = [11, 0], sizes = [1, 128], strides = [1, 1]} : vector<13x128xf32> to vector<1x128xf32>
    %132 = vector.broadcast %131 : vector<1x128xf32> to vector<13x128xf32>
    %133 = arith.mulf %125, %132 : vector<13x128xf32>
    %134 = arith.addf %123, %133 : vector<13x128xf32>
    %c12 = arith.constant 12 : index
    %c0_30 = arith.constant 0 : index
    %c0_31 = arith.constant 0 : index
    %135 = vector.load %arg4[%c12, %c0_30, %c0_31] : memref<13x13x128xf32, #tpu.memory_space<vmem>>, vector<1x13x128xf32>
    %136 = vector.shape_cast %135 : vector<1x13x128xf32> to vector<13x128xf32>
    %c12_i32 = arith.constant 12 : i32
    %137 = vector.broadcast %c12_i32 : i32 to vector<1x128xi32>
    %138 = arith.cmpi eq, %1, %137 : vector<1x128xi32>
    %139 = vector.shape_cast %138 : vector<1x128xi1> to vector<1x128xi1>
    %140 = vector.broadcast %139 : vector<1x128xi1> to vector<13x128xi1>
    %141 = arith.select %140, %136, %130 : vector<13x128xi1>, vector<13x128xf32>
    %142 = vector.extract_strided_slice %0 {offsets = [12, 0], sizes = [1, 128], strides = [1, 1]} : vector<13x128xf32> to vector<1x128xf32>
    %143 = vector.broadcast %142 : vector<1x128xf32> to vector<13x128xf32>
    %144 = arith.mulf %136, %143 : vector<13x128xf32>
    %145 = arith.addf %134, %144 : vector<13x128xf32>
    %146 = arith.subf %2, %141 : vector<13x128xf32>
    %147 = arith.subf %2, %145 : vector<13x128xf32>
    %148 = arith.mulf %147, %146 : vector<13x128xf32>
    %cst_32 = arith.constant dense<0.000000e+00> : vector<128xf32>
    %149 = vector.multi_reduction <add>, %148, %cst_32 [0] : vector<13x128xf32> to vector<128xf32>
    %150 = vector.shape_cast %149 : vector<128xf32> to vector<1x128xf32>
    %151 = arith.mulf %146, %146 : vector<13x128xf32>
    %cst_33 = arith.constant dense<0.000000e+00> : vector<128xf32>
    %152 = vector.multi_reduction <add>, %151, %cst_33 [0] : vector<13x128xf32> to vector<128xf32>
    %153 = vector.shape_cast %152 : vector<128xf32> to vector<1x128xf32>
    %154 = math.sqrt %153 : vector<1x128xf32>
    %155 = arith.mulf %147, %147 : vector<13x128xf32>
    %cst_34 = arith.constant dense<0.000000e+00> : vector<128xf32>
    %156 = vector.multi_reduction <add>, %155, %cst_34 [0] : vector<13x128xf32> to vector<128xf32>
    %157 = vector.shape_cast %156 : vector<128xf32> to vector<1x128xf32>
    %158 = math.rsqrt %157 : vector<1x128xf32>
    %159 = arith.mulf %150, %158 : vector<1x128xf32>
    %160 = arith.subf %154, %159 : vector<1x128xf32>
    %161 = tpu.iota {dimensions = array<i32: 1>} : vector<1x128xi32>
    %c128_i32 = arith.constant 128 : i32
    %162 = arith.muli %arg0, %c128_i32 : i32
    %163 = vector.broadcast %162 : i32 to vector<1x128xi32>
    %164 = arith.addi %163, %161 : vector<1x128xi32>
    %c8_i32_35 = arith.constant 8 : i32
    %165 = vector.broadcast %c8_i32_35 : i32 to vector<1x128xi32>
    %166 = arith.cmpi slt, %164, %165 : vector<1x128xi32>
    %cst_36 = arith.constant 0.000000e+00 : f32
    %167 = vector.broadcast %cst_36 : f32 to vector<1x128xf32>
    %168 = arith.select %166, %160, %167 : vector<1x128xi1>, vector<1x128xf32>
    %c0_37 = arith.constant 0 : index
    %c0_38 = arith.constant 0 : index
    %169 = vector.load %arg5[%c0_37, %c0_38] : memref<1x128xf32, #tpu.memory_space<vmem>>, vector<1x128xf32>
    tpu.vector_store %arg5[%c0_37, %c0_38], %168 {strides = array<i32>} : memref<1x128xf32, #tpu.memory_space<vmem>>, vector<1x128xf32>,
    return
  }
  func.func @transform_0(%arg0: i32) -> (i32, i32) {
    %c0_i32 = arith.constant 0 : i32
    %c0_i32_0 = arith.constant 0 : i32
    return %c0_i32, %arg0 : i32, i32
  }
  func.func @transform_1(%arg0: i32) -> (i32, i32) {
    %c0_i32 = arith.constant 0 : i32
    %c0_i32_0 = arith.constant 0 : i32
    return %c0_i32, %arg0 : i32, i32
  }
  func.func @transform_2(%arg0: i32) -> (i32, i32) {
    %c0_i32 = arith.constant 0 : i32
    %c0_i32_0 = arith.constant 0 : i32
    return %c0_i32, %arg0 : i32, i32
  }
  func.func @transform_3(%arg0: i32) -> (i32, i32, i32) {
    %c0_i32 = arith.constant 0 : i32
    %c0_i32_0 = arith.constant 0 : i32
    %c0_i32_1 = arith.constant 0 : i32
    return %c0_i32, %c0_i32_0, %arg0 : i32, i32, i32
  }
  func.func @transform_4(%arg0: i32) -> (i32, i32) {
    %c0_i32 = arith.constant 0 : i32
    %c0_i32_0 = arith.constant 0 : i32
    return %c0_i32, %arg0 : i32, i32
  }
}

</mosaic_0001>

<bundles_post_ra>
// kernel: _r_norm_forward_impl.1
= control target key start
LH: loop header
LB: loop body
LE: loop exit
PB: predicated region body
PF: predicated region fallthrough
CT: control target
= control target key end

     0   :  { %v26_v0 = vlaneseq  ;;  %v365_v4 = vmov 0   ;;  %s605_s0 = inlined_call_operand.vmem [shape: f32[13,128], index: 0, kind: input, shape index: {}]   ;;  %s606_s1 = inlined_call_operand.vmem [shape: s32[1,128], index: 1, kind: input, shape index: {}]   ;;  %s607_s3 = inlined_call_operand.vmem [shape: f32[13,13,128], index: 3, kind: input, shape index: {}]   ;;  %s608_s2 = inlined_call_operand.vmem [shape: f32[13,128], index: 2, kind: input, shape index: {}]   ;;  %s609_s4 = inlined_call_operand.vmem [shape: f32[1,128], index: 4, kind: output, shape index: {}]  }
   0x1   :  { %v394_v1 = vld [vmem:[%s606_s1] sm:$0x1]  ;;  %v23_v9 = vld [vmem:[%s607_s3 + $0x8] sm:$0x1f]  ;;  %v336_v14 = vld [vmem:[%s607_s3 + $0x10] sm:$0xff] }
   0x2   :  { %vm24_vm0 = vcmp.eq.s32.totalorder %v394_v1, 0  ;;  %v398_v2 = vshrl.u32 %v26_v0, 7  ;;  %v403_v3 = vld [vmem:[%s605_s0] sm:$0xff]  ;;  %vm42_vm1 = vcmp.eq.s32.totalorder %v394_v1, 1  ;;  %vm62_vm2 = vcmp.eq.s32.totalorder %v394_v1, 2  ;;  %v340_v36 = vld [vmem:[%s607_s3 + $0x30] sm:$0xff] }
   0x3   :  { %v25_v5 = vsel %vm24_vm0, 1, %v365_v4  ;;  %v22_v8 = vld [vmem:[%s607_s3] sm:$0xff]  ;;  %v43_v10 = vsel %vm42_vm1, 1, %v365_v4  ;;  %v337_v15 = vld [vmem:[%s607_s3 + $0x18] sm:$0x1f]  ;;  %v63_v19 = vsel %vm62_vm2, 1, %v365_v4 }
   0x4   :  { %v407_v6 = vsub.s32 0, %v398_v2  ;;  %v53_v7 = vsub.s32 1, %v398_v2  ;;  %v73_v11 = vsub.s32 2, %v398_v2  ;;  %v338_v18 = vld [vmem:[%s607_s3 + $0x20] sm:$0xff]  ;;  %vm82_vm3 = vcmp.eq.s32.totalorder %v394_v1, 3  ;;  %v344_v59 = vld [vmem:[%s607_s3 + $0x50] sm:$0xff] }
   0x5   :  { %v93_v21 = vsub.s32 3, %v398_v2  ;;  %v339_v24 = vld [vmem:[%s607_s3 + $0x28] sm:$0x1f]  ;;  %v341_v37 = vld [vmem:[%s607_s3 + $0x38] sm:$0x1f]  ;;  %v83_v38 = vsel %vm82_vm3, 1, %v365_v4 }
   0x6   :  { %v29_v12 = vrot.slane %v25_v5, %v407_v6  ;;  %v36_v13 = vrot.slane %v403_v3, %v407_v6  ;;  %v47_v16 = vrot.slane %v43_v10, %v407_v6  ;;  %v54_v17 = vrot.slane %v403_v3, %v53_v7  ;;  %v342_v54 = vld [vmem:[%s607_s3 + $0x40] sm:$0xff]  ;;  %v343_v55 = vld [vmem:[%s607_s3 + $0x48] sm:$0x1f]  ;;  %v345_v60 = vld [vmem:[%s607_s3 + $0x58] sm:$0x1f] }
   0x7   :  { %v74_v20 = vrot.slane %v403_v3, %v73_v11  ;;  %v67_v31 = vrot.slane %v63_v19, %v407_v6  ;;  %v87_v39 = vrot.slane %v83_v38, %v407_v6  ;;  %v94_v40 = vrot.slane %v403_v3, %v93_v21  ;;  %v350_v38 = vld [vmem:[%s607_s3 + $0x80] sm:$0xff] }
   0x8   :  { %vm30_vm4 = vcmp.eq.s32.totalorder %v29_v12, 1  ;;  %v37_v22 = vmul.f32 %v36_v13, %v22_v8  ;;  %v38_v23 = vmul.f32 %v36_v13, %v23_v9  ;;  %vm48_vm5 = vcmp.eq.s32.totalorder %v47_v16, 1 }
   0x9   :  { %v31_v25 = vsel %vm30_vm4, %v22_v8, 0.0  ;;  %v32_v26 = vsel %vm30_vm4, %v23_v9, 0.0  ;;  %v55_v27 = vmul.f32 %v336_v14, %v54_v17  ;;  %v56_v28 = vmul.f32 %v337_v15, %v54_v17 }
   0xa   :  { %v49_v29 = vsel %vm48_vm5, %v336_v14, %v31_v25  ;;  %v50_v30 = vsel %vm48_vm5, %v337_v15, %v32_v26  ;;  %v75_v32 = vmul.f32 %v338_v18, %v74_v20  ;;  %v76_v35 = vmul.f32 %v339_v24, %v74_v20 }
   0xb   :  { %v57_v33 = vadd.f32 %v55_v27, %v37_v22  ;;  %v58_v34 = vadd.f32 %v56_v28, %v38_v23  ;;  %vm68_vm6 = vcmp.eq.s32.totalorder %v67_v31, 1  ;;  %vm102_vm7 = vcmp.eq.s32.totalorder %v394_v1, 4  ;;  %v346_v22 = vld [vmem:[%s607_s3 + $0x60] sm:$0xff]  ;;  %v347_v23 = vld [vmem:[%s607_s3 + $0x68] sm:$0x1f] }
   0xc   :  { %v69_v41 = vsel %vm68_vm6, %v338_v18, %v49_v29  ;;  %v70_v42 = vsel %vm68_vm6, %v339_v24, %v50_v30  ;;  %vm88_vm8 = vcmp.eq.s32.totalorder %v87_v39, 1  ;;  %v95_v45 = vmul.f32 %v340_v36, %v94_v40  ;;  %v504_v24 = vld [vmem:[%s605_s0 + $0x8] sm:$0x1f] }
   0xd   :  { %v77_v43 = vadd.f32 %v75_v32, %v57_v33  ;;  %v78_v44 = vadd.f32 %v76_v35, %v58_v34  ;;  %v96_v46 = vmul.f32 %v341_v37, %v94_v40  ;;  %v103_v47 = vsel %vm102_vm7, 1, %v365_v4  ;;  %v348_v32 = vld [vmem:[%s607_s3 + $0x70] sm:$0xff]  ;;  %v349_v33 = vld [vmem:[%s607_s3 + $0x78] sm:$0x1f]  ;;  %v351_v39 = vld [vmem:[%s607_s3 + $0x88] sm:$0x1f] }
   0xe   :  { %v89_v48 = vsel %vm88_vm8, %v340_v36, %v69_v41  ;;  %v90_v49 = vsel %vm88_vm8, %v341_v37, %v70_v42  ;;  %v107_v50 = vrot.slane %v103_v47, %v407_v6  ;;  %v113_v51 = vsub.s32 4, %v398_v2 }
   0xf   :  { %v97_v52 = vadd.f32 %v95_v45, %v77_v43  ;;  %v98_v53 = vadd.f32 %v96_v46, %v78_v44  ;;  %vm122_vm9 = vcmp.eq.s32.totalorder %v394_v1, 5  ;;  %v133_v56 = vsub.s32 5, %v398_v2 }
  0x10   :  { %vm471_vm10 = vcmp.eq.s32.totalorder %v107_v50, 1  ;;  %v114_v58 = vrot.slane %v403_v3, %v113_v51  ;;  %v123_v61 = vsel %vm122_vm9, 1, %v365_v4  ;;  %vm142_vm11 = vcmp.eq.s32.totalorder %v394_v1, 6 }
  0x11   :  { %v109_v62 = vsel %vm471_vm10, %v342_v54, %v89_v48  ;;  %v110_v63 = vsel %vm471_vm10, %v343_v55, %v90_v49  ;;  %v127_v5 = vrot.slane %v123_v61, %v407_v6  ;;  %v134_v8 = vrot.slane %v403_v3, %v133_v56 }
  0x12   :  { %v115_v9 = vmul.f32 %v342_v54, %v114_v58  ;;  %v116_v10 = vmul.f32 %v343_v55, %v114_v58  ;;  %v143_v12 = vsel %vm142_vm11, 1, %v365_v4  ;;  %v153_v13 = vsub.s32 6, %v398_v2  ;;  %v353_v54 = vld [vmem:[%s607_s3 + $0x98] sm:$0x1f] }
  0x13   :  { %vm128_vm12 = vcmp.eq.s32.totalorder %v127_v5, 1  ;;  %v135_v14 = vmul.f32 %v344_v59, %v134_v8  ;;  %v136_v15 = vmul.f32 %v345_v60, %v134_v8  ;;  %v147_v16 = vrot.slane %v143_v12, %v407_v6  ;;  %v354_v5 = vld [vmem:[%s607_s3 + $0xa0] sm:$0xff]  ;;  %v355_v8 = vld [vmem:[%s607_s3 + $0xa8] sm:$0x1f] }
  0x14   :  { %v117_v17 = vadd.f32 %v115_v9, %v97_v52  ;;  %v118_v18 = vadd.f32 %v116_v10, %v98_v53  ;;  %v129_v19 = vsel %vm128_vm12, %v344_v59, %v109_v62  ;;  %v130_v20 = vsel %vm128_vm12, %v345_v60, %v110_v63  ;;  %v352_v53 = vld [vmem:[%s607_s3 + $0x90] sm:$0xff] }
  0x15   :  { %vm506_vm13 = vcmp.eq.s32.totalorder %v147_v16, 1  ;;  %v154_v26 = vrot.slane %v403_v3, %v153_v13  ;;  %vm162_vm14 = vcmp.eq.s32.totalorder %v394_v1, 7  ;;  %v173_v27 = vsub.s32 7, %v398_v2 }
  0x16   :  { %v137_v28 = vadd.f32 %v135_v14, %v117_v17  ;;  %v138_v29 = vadd.f32 %v136_v15, %v118_v18  ;;  %v149_v30 = vsel %vm506_vm13, %v346_v22, %v129_v19  ;;  %v150_v31 = vsel %vm506_vm13, %v347_v23, %v130_v20  ;;  %v356_v20 = vld [vmem:[%s607_s3 + $0xb0] sm:$0xff] }
  0x17   :  { %v155_v34 = vmul.f32 %v346_v22, %v154_v26  ;;  %v156_v35 = vmul.f32 %v347_v23, %v154_v26  ;;  %v163_v36 = vsel %vm162_vm14, 1, %v365_v4  ;;  %v174_v37 = vrot.slane %v403_v3, %v173_v27  ;;  %v357_v22 = vld [vmem:[%s607_s3 + $0xb8] sm:$0x1f] }
  0x18   :  { %v167_v40 = vrot.slane %v163_v36, %v407_v6  ;;  %vm182_vm15 = vcmp.eq.s32.totalorder %v394_v1, 8  ;;  %v194_v41 = vrot.slane %v504_v24, %v407_v6  ;;  %vm202_vm0 = vcmp.eq.s32.totalorder %v394_v1, 9  ;;  %v21_v36 = vld [vmem:[%s608_s2 + $0x8] sm:$0x1f] }
  0x19   :  { %v157_v42 = vadd.f32 %v155_v34, %v137_v28  ;;  %v158_v43 = vadd.f32 %v156_v35, %v138_v29  ;;  %v175_v3 = vmul.f32 %v348_v32, %v174_v37  ;;  %v176_v44 = vmul.f32 %v349_v33, %v174_v37 }
  0x1a   :  { %vm168_vm1 = vcmp.eq.s32.totalorder %v167_v40, 1  ;;  %v183_v45 = vsel %vm182_vm15, 1, %v365_v4  ;;  %v195_v46 = vmul.f32 %v350_v38, %v194_v41  ;;  %v196_v47 = vmul.f32 %v351_v39, %v194_v41 }
  0x1b   :  { %v169_v48 = vsel %vm168_vm1, %v348_v32, %v149_v30  ;;  %v170_v49 = vsel %vm168_vm1, %v349_v33, %v150_v31  ;;  %v177_v50 = vadd.f32 %v175_v3, %v157_v42  ;;  %v178_v52 = vadd.f32 %v176_v44, %v158_v43  ;;  %v358_v32 = vld [vmem:[%s607_s3 + $0xc0] sm:$0xff]  ;;  %v359_v33 = vld [vmem:[%s607_s3 + $0xc8] sm:$0x1f] }
  0x1c   :  { %v187_v55 = vrot.slane %v183_v45, %v407_v6  ;;  %v203_v56 = vsel %vm202_vm0, 1, %v365_v4  ;;  %v214_v57 = vrot.slane %v504_v24, %v53_v7  ;;  %vm222_vm2 = vcmp.eq.s32.totalorder %v394_v1, 10 }
  0x1d   :  { %v197_v58 = vadd.f32 %v195_v46, %v177_v50  ;;  %v198_v59 = vadd.f32 %v196_v47, %v178_v52  ;;  %v207_v60 = vrot.slane %v203_v56, %v407_v6  ;;  %v223_v61 = vsel %vm222_vm2, 1, %v365_v4 }
  0x1e   :  { %vm188_vm3 = vcmp.eq.s32.totalorder %v187_v55, 1  ;;  %v215_v62 = vmul.f32 %v352_v53, %v214_v57  ;;  %v216_v63 = vmul.f32 %v353_v54, %v214_v57  ;;  %v227_v7 = vrot.slane %v223_v61, %v407_v6 }
  0x1f   :  { %v189_v9 = vsel %vm188_vm3, %v350_v38, %v169_v48  ;;  %v190_v10 = vsel %vm188_vm3, %v351_v39, %v170_v49  ;;  %vm208_vm4 = vcmp.eq.s32.totalorder %v207_v60, 1  ;;  %v234_v12 = vrot.slane %v504_v24, %v73_v11 }
  0x20   :  { %v209_v13 = vsel %vm208_vm4, %v352_v53, %v189_v9  ;;  %v210_v14 = vsel %vm208_vm4, %v353_v54, %v190_v10  ;;  %v217_v15 = vadd.f32 %v215_v62, %v197_v58  ;;  %v218_v16 = vadd.f32 %v216_v63, %v198_v59 }
  0x21   :  { %vm563_vm5 = vcmp.eq.s32.totalorder %v227_v7, 1  ;;  %v235_v18 = vmul.f32 %v354_v5, %v234_v12  ;;  %v236_v19 = vmul.f32 %v355_v8, %v234_v12  ;;  %vm242_vm6 = vcmp.eq.s32.totalorder %v394_v1, 11 }
  0x22   :  { %v229_v11 = vsel %vm563_vm5, %v354_v5, %v209_v13  ;;  %v230_v23 = vsel %vm563_vm5, %v355_v8, %v210_v14  ;;  %v243_v25 = vsel %vm242_vm6, 1, %v365_v4  ;;  %v254_v26 = vrot.slane %v504_v24, %v93_v21 }
  0x23   :  { %v237_v27 = vadd.f32 %v235_v18, %v217_v15  ;;  %v238_v28 = vadd.f32 %v236_v19, %v218_v16  ;;  %v247_v29 = vrot.slane %v243_v25, %v407_v6  ;;  %vm262_vm7 = vcmp.eq.s32.totalorder %v394_v1, 12  ;;  %v20_v1 = vld [vmem:[%s608_s2] sm:$0xff] }
  0x24   :  { %v255_v30 = vmul.f32 %v356_v20, %v254_v26  ;;  %v256_v31 = vmul.f32 %v357_v22, %v254_v26  ;;  %v263_v34 = vsel %vm262_vm7, 1, %v365_v4  ;;  %v274_v21 = vrot.slane %v504_v24, %v113_v51 }
  0x25   :  { %vm248_vm8 = vcmp.eq.s32.totalorder %v247_v29, 1  ;;  %v267_v35 = vrot.slane %v263_v34, %v407_v6  ;;  %vm285_vm10 = vcmask 1044480  }
  0x26   :  { %v249_v37 = vsel %vm248_vm8, %v356_v20, %v229_v11  ;;  %v250_v38 = vsel %vm248_vm8, %v357_v22, %v230_v23  ;;  %v257_v39 = vadd.f32 %v255_v30, %v237_v27  ;;  %v258_v40 = vadd.f32 %v256_v31, %v238_v28 }
  0x27   :  { %vm268_vm9 = vcmp.eq.s32.totalorder %v267_v35, 1  ;;  %v275_v4 = vmul.f32 %v358_v32, %v274_v21  ;;  %v276_v2 = vmul.f32 %v359_v33, %v274_v21  ;;  %v325_v11 = vand.u32 127, %v26_v0 }
  0x28   :  { %v269_v41 = vsel %vm268_vm9, %v358_v32, %v249_v37  ;;  %v270_v51 = vsel %vm268_vm9, %v359_v33, %v250_v38 }
  0x29   :  { %v277_v24 = vadd.f32 %v275_v4, %v257_v39  ;;  %v278_v42 = vadd.f32 %v276_v2, %v258_v40  ;;  %v279_v6 = vsub.f32 %v20_v1, %v269_v41  ;;  %v280_v43 = vsub.f32 %v21_v36, %v270_v51 }
  0x2a   :  { %vm329_vm13 = vcmp.lt.s32.totalorder %v325_v11, 8 }
  0x2b   :  { %v281_v3 = vsub.f32 %v20_v1, %v277_v24  ;;  %v282_v44 = vsub.f32 %v21_v36, %v278_v42  ;;  %v294_v45 = vmul.f32 %v279_v6, %v279_v6  ;;  %v295_v46 = vmul.f32 %v280_v43, %v280_v43 }
  0x2d   :  { %v283_v47 = vmul.f32 %v281_v3, %v279_v6  ;;  %v284_v48 = vmul.f32 %v282_v44, %v280_v43  ;;  %v296_v49 = vsel %vm285_vm10, %v295_v46, 0.0  ;;  %v311_v50 = vmul.f32 %v281_v3, %v281_v3 }
  0x2e   :  { %v297_v52 = vadd.f32 %v296_v49, %v294_v45  ;;  %v312_v53 = vmul.f32 %v282_v44, %v282_v44 }
  0x2f   :  { %v286_v54 = vsel %vm285_vm10, %v284_v48, 0.0 }
  0x30   :  { %v287_v55 = vadd.f32 %v286_v54, %v283_v47  ;;  %v298_v56 = vrot.slane %v297_v52, 4  ;;  %v313_v57 = vsel %vm285_vm10, %v312_v53, 0.0 }
  0x31   :  { %v314_v58 = vadd.f32 %v313_v57, %v311_v50 }
  0x32   :  { %v288_v59 = vrot.slane %v287_v55, 4  ;;  %v299_v60 = vadd.f32 %v298_v56, %v297_v52 }
  0x33   :  { %v315_v61 = vrot.slane %v314_v58, 4 }
  0x34   :  { %v300_v62 = vrot.slane %v299_v60, 2  ;;  %v289_v5 = vadd.f32 %v288_v59, %v287_v55 }
  0x35   :  { %v316_v63 = vadd.f32 %v315_v61, %v314_v58 }
  0x36   :  { %v301_v8 = vadd.f32 %v300_v62, %v299_v60  ;;  %v290_v12 = vrot.slane %v289_v5, 2 }
  0x37   :  { %v317_v7 = vrot.slane %v316_v63, 2 }
  0x38   :  { %v302_v9 = vrot.slane %v301_v8, 1  ;;  %v291_v16 = vadd.f32 %v290_v12, %v289_v5 }
  0x39   :  { %v318_v10 = vadd.f32 %v317_v7, %v316_v63 }
  0x3a   :  { %v303_v13 = vadd.f32 %v302_v9, %v301_v8  ;;  %v292_v17 = vrot.slane %v291_v16, 1 }
  0x3b   :  { %v319_v14 = vrot.slane %v318_v10, 1 }
  0x3c   :  { %361 = vrsqrt.f32 %v303_v13  ;;  %v293_v19 = vadd.f32 %v292_v17, %v291_v16  ;;  %vm306_vm11 = vcmp.eq.f32.partialorder %v303_v13, inf  ;;  %v309_v20 = vand.u32 2147483648, %v303_v13 }
  0x3d   :  { %v320_v15 = vadd.f32 %v319_v14, %v318_v10  ;;  %vm308_vm12 = vcmp.eq.f32.partialorder %v303_v13, 0.0 }
  0x3f   :  { %363 = vrsqrt.f32 %v320_v15 }
  0x46   :  { %v362_v18 = vpop.eup %361 }
  0x47   :  { %v305_v22 = vmul.f32 %v362_v18, %v303_v13 }
  0x49   :  { %v364_v23 = vpop.eup %363  ;;  %v307_v25 = vsel %vm306_vm11, %v303_v13, %v305_v22 }
  0x4a   :  { %v310_v26 = vsel %vm308_vm12, %v309_v20, %v307_v25  ;;  %v322_v27 = vmul.f32 %v364_v23, %v293_v19 }
  0x4c   :  { %v323_v28 = vsub.f32 %v310_v26, %v322_v27 }
  0x4e   :  { %v330_v29 = vsel %vm329_vm13, %v323_v28, 0.0 }
  0x4f   :  { %331 = vst [vmem:[%s609_s4] sm:$0x1] %v330_v29 }

</bundles_post_ra>
